<compile_context>
chip_gen: v5e
topology: v5e:2x2
jax: 0.10.0
libtpu: 0.0.40
codegen_flags: <defaults>
</compile_context>

<pallas_src>
import functools

import jax
import jax.numpy as jnp
from jax import lax
from jax.experimental import pallas as pl
from jax.experimental.pallas import tpu as pltpu

INPUT_SIZE = 784
HIDDEN_SIZE = 100
HIDDEN_PAD = 128          # lane-dense, MXU-aligned hidden dim (zero-padded)
NUM_CLASSES = 10

_NT = (((1,), (1,)), ((), ()))  # contract last dims: x[., K] @ w[N, K] -> [., N]


def _mlp_kernel(x_ref, w1_ref, b1_ref, w2_ref, b2_ref, o_ref, *, compute_dtype):
    # Hidden layer: [tb, 784] x [128, 784]^T  (f32 MXU accumulation).
    x = x_ref[...]
    if x.dtype != compute_dtype:
        x = x.astype(compute_dtype)
    h = lax.dot_general(x, w1_ref[...], _NT, preferred_element_type=jnp.float32)
    h = jnp.maximum(h + b1_ref[...], 0.0)            # bias + ReLU in f32
    # Output layer: [tb, 128] x [10, 128]^T.
    h = h.astype(compute_dtype)
    out = lax.dot_general(h, w2_ref[...], _NT, preferred_element_type=jnp.float32)
    o_ref[...] = (out + b2_ref[...]).astype(o_ref.dtype)


def _round_up(x, m):
    return ((x + m - 1) // m) * m


def _tpu_generation():
    """Best-effort TPU generation detection (None if unknown)."""
    try:
        kind = jax.devices()[0].device_kind.lower()
    except Exception:
        return None
    if "v5e" in kind or "v5 lite" in kind or "v5lite" in kind:
        return 5
    if "v6" in kind:
        return 6
    if "v7" in kind or "tpu7" in kind:
        return 7
    return None


def prepare_params(w1, b1, w2, b2, compute_dtype=jnp.float32):
    """One-time param prep: pad hidden 100->128 (numerically exact: padded w1
    rows / b1 entries / w2 columns are zero) and cast weights to compute_dtype.
    For a training loop, call this once per step outside the hot path and pass
    the results to mnist_mlp_forward_prepared to avoid per-call pad/cast ops."""
    pad_h = HIDDEN_PAD - HIDDEN_SIZE
    w1p = jnp.pad(w1, ((0, pad_h), (0, 0))).astype(compute_dtype)      # [128, 784]
    b1p = jnp.pad(b1, (0, pad_h)).reshape(1, -1).astype(jnp.float32)   # [1, 128]
    w2p = jnp.pad(w2, ((0, 0), (0, pad_h))).astype(compute_dtype)      # [10, 128]
    b2p = b2.reshape(1, -1).astype(jnp.float32)                        # [1, 10]
    return w1p, b1p, w2p, b2p


def mnist_mlp_forward_prepared(x, w1p, b1p, w2p, b2p, *, tile_b=None,
                               compute_dtype=jnp.float32):
    """x: [B, 784] (f32 or bf16); prepared/padded params from prepare_params."""
    B = x.shape[0]
    gen = _tpu_generation()

    if tile_b is None:
        tile_b = {7: 2048, 6: 4096, 5: 4096}.get(gen, 1024)

    # Batch tile: sublane-aligned, never larger than the batch.
    tb = min(tile_b, _round_up(B, 8))
    if gen == 7 and B > 8:
        # Guarantee >= 2 grid steps so "parallel" sharding engages both TCs.
        tb = min(tb, _round_up((B + 1) // 2, 8))
    tb = max(tb, 8)
    grid = (pl.cdiv(B, tb),)

    # VMEM budget (bytes): double-buffered x tiles, in-kernel cast copy of x,
    # resident weights/biases, h (f32 + compute copy), double-buffered out.
    x_item = jnp.dtype(x.dtype).itemsize
    c_item = jnp.dtype(compute_dtype).itemsize
    budget = (
        2 * tb * INPUT_SIZE * x_item
        + (tb * INPUT_SIZE * c_item if jnp.dtype(x.dtype) != jnp.dtype(compute_dtype) else 0)
        + (HIDDEN_PAD * INPUT_SIZE + NUM_CLASSES * HIDDEN_PAD) * c_item
        + (HIDDEN_PAD + NUM_CLASSES) * 4
        + tb * HIDDEN_PAD * (4 + c_item)
        + 2 * tb * NUM_CLASSES * x_item
    )
    vmem_cap = (96 * 1024 * 1024) if gen in (5, 6) else (48 * 1024 * 1024)
    vmem_limit = min(max(int(budget * 1.5), 32 * 1024 * 1024), vmem_cap)

    resident = lambda shape: pl.BlockSpec(shape, lambda i: (0,) * len(shape))
    kernel = functools.partial(_mlp_kernel, compute_dtype=compute_dtype)

    return pl.pallas_call(
        kernel,
        out_shape=jax.ShapeDtypeStruct((B, NUM_CLASSES), x.dtype),
        grid=grid,
        in_specs=[
            pl.BlockSpec((tb, INPUT_SIZE), lambda i: (i, 0)),   # streamed x tile
            resident((HIDDEN_PAD, INPUT_SIZE)),                 # w1 resident
            resident((1, HIDDEN_PAD)),                          # b1 resident
            resident((NUM_CLASSES, HIDDEN_PAD)),                # w2 resident
            resident((1, NUM_CLASSES)),                         # b2 resident
        ],
        out_specs=pl.BlockSpec((tb, NUM_CLASSES), lambda i: (i, 0)),
        compiler_params=pltpu.CompilerParams(
            dimension_semantics=("parallel",),      # megacore sharding on v7x
            vmem_limit_bytes=vmem_limit,
        ),
    )(x, w1p, b1p, w2p, b2p)


def mnist_mlp_forward(x, w1, b1, w2, b2, *, tile_b=None, compute_dtype=None):
    """Convenience wrapper taking raw PyTorch-layout params.

    x: [B, 784]; w1: [100, 784]; b1: [100]; w2: [10, 100]; b2: [10].
    compute_dtype=None -> auto: bf16 matmuls on v5e (f32 accumulation),
    f32 elsewhere (exact PyTorch semantics).
    """
    if compute_dtype is None:
        compute_dtype = jnp.bfloat16 if _tpu_generation() == 5 else jnp.float32
    params = prepare_params(w1, b1, w2, b2, compute_dtype)
    return mnist_mlp_forward_prepared(x, *params, tile_b=tile_b,
                                      compute_dtype=compute_dtype)


def init_params(key):
    """Deterministic init mimicking nn.Linear's uniform(-1/sqrt(fan_in), +)."""
    k1, k2, k3, k4 = jax.random.split(key, 4)
    bound1 = 1.0 / (INPUT_SIZE ** 0.5)
    bound2 = 1.0 / (HIDDEN_SIZE ** 0.5)
    w1 = jax.random.uniform(k1, (HIDDEN_SIZE, INPUT_SIZE), jnp.float32,
                            -bound1, bound1)
    b1 = jax.random.uniform(k2, (HIDDEN_SIZE,), jnp.float32, -bound1, bound1)
    w2 = jax.random.uniform(k3, (NUM_CLASSES, HIDDEN_SIZE), jnp.float32,
                            -bound2, bound2)
    b2 = jax.random.uniform(k4, (NUM_CLASSES,), jnp.float32, -bound2, bound2)
    return w1, b1, w2, b2


if __name__ == "__main__":
    key = jax.random.PRNGKey(0)
    kx, kp = jax.random.split(key)

    batch = 8
    x = jax.random.normal(kx, (batch, INPUT_SIZE), jnp.float32)
    w1, b1, w2, b2 = init_params(kp)

    # Pure-JAX reference (same semantics as the PyTorch module).
    ref = jnp.maximum(x @ w1.T + b1, 0.0) @ w2.T + b2

    # Exact f32 path (PyTorch forward semantics).
    out = jax.block_until_ready(
        mnist_mlp_forward(x, w1, b1, w2, b2, compute_dtype=jnp.float32))
    assert out.shape == (batch, NUM_CLASSES)
    assert jnp.allclose(out, ref, atol=1e-4, rtol=1e-4)

    # Generation-aware auto path (bf16 matmuls on v5e, f32 elsewhere).
    out_auto = jax.block_until_ready(mnist_mlp_forward(x, w1, b1, w2, b2))
    assert jnp.allclose(out_auto, ref, atol=5e-2, rtol=5e-2)

    # Explicit bf16-matmul / f32-accumulate path (mem-roofline friendly).
    out_bf16 = jax.block_until_ready(
        mnist_mlp_forward(x, w1, b1, w2, b2, compute_dtype=jnp.bfloat16))
    assert jnp.allclose(out_bf16, ref, atol=5e-2, rtol=5e-2)

    print("KERNEL_OK")
</pallas_src>

<mosaic_0001>
module attributes {stable_mosaic.version = 11 : i64} {
  func.func @_mlp_kernel(%arg0: i32, %arg1: memref<8x784xf32, #tpu.memory_space<vmem>>, %arg2: memref<128x784xf32, #tpu.memory_space<vmem>>, %arg3: memref<1x128xf32, #tpu.memory_space<vmem>>, %arg4: memref<10x128xf32, #tpu.memory_space<vmem>>, %arg5: memref<1x10xf32, #tpu.memory_space<vmem>>, %arg6: memref<8x10xf32, #tpu.memory_space<vmem>>) attributes {dimension_semantics = [#tpu.dimension_semantics<parallel>], iteration_bounds = array<i64: 1>, scalar_prefetch = 0 : i64, scratch_operands = 0 : i64, tpu.core_type = #tpu.core_type<tc>, window_params = [{transform_indices = @transform_0, window_bounds = array<i64: 8, 784>}, {pipeline_mode = #tpu.pipeline_mode<synchronous>, transform_indices = @transform_1, window_bounds = array<i64: 128, 784>}, {pipeline_mode = #tpu.pipeline_mode<synchronous>, transform_indices = @transform_2, window_bounds = array<i64: 1, 128>}, {pipeline_mode = #tpu.pipeline_mode<synchronous>, transform_indices = @transform_3, window_bounds = array<i64: 10, 128>}, {pipeline_mode = #tpu.pipeline_mode<synchronous>, transform_indices = @transform_4, window_bounds = array<i64: 1, 10>}, {transform_indices = @transform_5, window_bounds = array<i64: 8, 10>}]} {
    %c0 = arith.constant 0 : index
    %c0_0 = arith.constant 0 : index
    %0 = vector.load %arg1[%c0, %c0_0] : memref<8x784xf32, #tpu.memory_space<vmem>>, vector<8x784xf32>
    %c0_1 = arith.constant 0 : index
    %c0_2 = arith.constant 0 : index
    %1 = vector.load %arg2[%c0_1, %c0_2] : memref<128x784xf32, #tpu.memory_space<vmem>>, vector<128x784xf32>
    %cst = arith.constant dense<0.000000e+00> : vector<8x128xf32>
    %2 = tpu.matmul %0, %1, %cst {dimension_numbers = #tpu.dot_dimension_numbers<[1], [1], [0], [0], [0, 0, 1, 0], [], []>} : vector<8x784xf32>, vector<128x784xf32>, vector<8x128xf32> -> vector<8x128xf32>
    %c0_3 = arith.constant 0 : index
    %c0_4 = arith.constant 0 : index
    %3 = vector.load %arg3[%c0_3, %c0_4] : memref<1x128xf32, #tpu.memory_space<vmem>>, vector<1x128xf32>
    %4 = vector.broadcast %3 : vector<1x128xf32> to vector<8x128xf32>
    %5 = arith.addf %2, %4 : vector<8x128xf32>
    %cst_5 = arith.constant 0.000000e+00 : f32
    %6 = vector.broadcast %cst_5 : f32 to vector<8x128xf32>
    %7 = arith.maximumf %5, %6 : vector<8x128xf32>
    %c0_6 = arith.constant 0 : index
    %c0_7 = arith.constant 0 : index
    %8 = vector.load %arg4[%c0_6, %c0_7] : memref<10x128xf32, #tpu.memory_space<vmem>>, vector<10x128xf32>
    %cst_8 = arith.constant dense<0.000000e+00> : vector<8x10xf32>
    %9 = tpu.matmul %7, %8, %cst_8 {dimension_numbers = #tpu.dot_dimension_numbers<[1], [1], [0], [0], [0, 0, 1, 0], [], []>} : vector<8x128xf32>, vector<10x128xf32>, vector<8x10xf32> -> vector<8x10xf32>
    %c0_9 = arith.constant 0 : index
    %c0_10 = arith.constant 0 : index
    %10 = vector.load %arg5[%c0_9, %c0_10] : memref<1x10xf32, #tpu.memory_space<vmem>>, vector<1x10xf32>
    %11 = vector.broadcast %10 : vector<1x10xf32> to vector<8x10xf32>
    %12 = arith.addf %9, %11 : vector<8x10xf32>
    %c0_11 = arith.constant 0 : index
    %c0_12 = arith.constant 0 : index
    %13 = vector.load %arg6[%c0_11, %c0_12] : memref<8x10xf32, #tpu.memory_space<vmem>>, vector<8x10xf32>
    tpu.vector_store %arg6[%c0_11, %c0_12], %12 {strides = array<i32>} : memref<8x10xf32, #tpu.memory_space<vmem>>, vector<8x10xf32>,
    return
  }
  func.func @transform_0(%arg0: i32) -> (i32, i32) {
    %c0_i32 = arith.constant 0 : i32
    %c0_i32_0 = arith.constant 0 : i32
    return %arg0, %c0_i32 : i32, i32
  }
  func.func @transform_1(%arg0: i32) -> (i32, i32) {
    %c0_i32 = arith.constant 0 : i32
    %c0_i32_0 = arith.constant 0 : i32
    %c0_i32_1 = arith.constant 0 : i32
    return %c0_i32, %c0_i32_0 : i32, i32
  }
  func.func @transform_2(%arg0: i32) -> (i32, i32) {
    %c0_i32 = arith.constant 0 : i32
    %c0_i32_0 = arith.constant 0 : i32
    %c0_i32_1 = arith.constant 0 : i32
    return %c0_i32, %c0_i32_0 : i32, i32
  }
  func.func @transform_3(%arg0: i32) -> (i32, i32) {
    %c0_i32 = arith.constant 0 : i32
    %c0_i32_0 = arith.constant 0 : i32
    %c0_i32_1 = arith.constant 0 : i32
    return %c0_i32, %c0_i32_0 : i32, i32
  }
  func.func @transform_4(%arg0: i32) -> (i32, i32) {
    %c0_i32 = arith.constant 0 : i32
    %c0_i32_0 = arith.constant 0 : i32
    %c0_i32_1 = arith.constant 0 : i32
    return %c0_i32, %c0_i32_0 : i32, i32
  }
  func.func @transform_5(%arg0: i32) -> (i32, i32) {
    %c0_i32 = arith.constant 0 : i32
    %c0_i32_0 = arith.constant 0 : i32
    return %arg0, %c0_i32 : i32, i32
  }
}

</mosaic_0001>

<bundles_post_ra>
// kernel: tpu_custom_call.1
= control target key start
LH: loop header
LB: loop body
LE: loop exit
PB: predicated region body
PF: predicated region fallthrough
CT: control target
= control target key end

     0   :  { %s847_s0 = inlined_call_operand.vmem [shape: f32[8,784], index: 0, kind: input, shape index: {}]   ;;  %s848_s1 = inlined_call_operand.vmem [shape: f32[128,784], index: 1, kind: input, shape index: {}]   ;;  %s849_s2 = inlined_call_operand.vmem [shape: f32[1,128], index: 2, kind: input, shape index: {}]   ;;  %s850_s3 = inlined_call_operand.vmem [shape: f32[10,128], index: 3, kind: input, shape index: {}]   ;;  %s851_s4 = inlined_call_operand.vmem [shape: f32[1,10], index: 4, kind: input, shape index: {}]   ;;  %s852_s5 = inlined_call_operand.hbm [shape: f32[8,10], index: 5, kind: output, shape index: {}]  }
   0x1   :  { %v135_v0 = vld [vmem:[%s848_s1 + $0x358] sm:$0xff]  ;;  %v133_v1 = vld [vmem:[%s848_s1 + $0x348] sm:$0xff]  ;;  %v134_v2 = vld [vmem:[%s848_s1 + $0x350] sm:$0xff] }
   0x2   :  { %236 = vmatpush.xpose.msra.mxu2 %v135_v0  ;;  %196 = vmatpush.xpose.msra.mxu0 %v133_v1  ;;  %v128_v3 = vld [vmem:[%s848_s1 + $0x320] sm:$0xff]  ;;  %v126_v4 = vld [vmem:[%s848_s1 + $0x310] sm:$0xff]  ;;  %v127_v5 = vld [vmem:[%s848_s1 + $0x318] sm:$0xff] }
   0x3   :  { %216 = vmatpush.xpose.msra.mxu1 %v134_v2  ;;  %v121_v6 = vld [vmem:[%s848_s1 + $0x2e8] sm:$0xff]  ;;  %v119_v7 = vld [vmem:[%s848_s1 + $0x2d8] sm:$0xff]  ;;  %v120_v8 = vld [vmem:[%s848_s1 + $0x2e0] sm:$0xff] }
   0x4   :  { %v114_v9 = vld [vmem:[%s848_s1 + $0x2b0] sm:$0xff]  ;;  %v112_v10 = vld [vmem:[%s848_s1 + $0x2a0] sm:$0xff]  ;;  %v113_v11 = vld [vmem:[%s848_s1 + $0x2a8] sm:$0xff] }
   0x6   :  { %237 = vmatpush.xpose.msra.mxu2 %v128_v3  ;;  %197 = vmatpush.xpose.msra.mxu0 %v126_v4 }
   0x7   :  { %217 = vmatpush.xpose.msra.mxu1 %v127_v5 }
   0xa   :  { %238 = vmatpush.xpose.msra.mxu2 %v121_v6  ;;  %198 = vmatpush.xpose.msra.mxu0 %v119_v7 }
   0xb   :  { %218 = vmatpush.xpose.msra.mxu1 %v120_v8 }
   0xc   :  { %10 = vsyncpa [#allocation3], 0  ;;  %v107_v12 = vld [vmem:[%s848_s1 + $0x278] sm:$0xff]  ;;  %v105_v13 = vld [vmem:[%s848_s1 + $0x268] sm:$0xff]  ;;  %vm144_vm0 = vcmask 130048   ;;  %s372_s14 = sshll.u32 %s852_s5, 4  ;;  %s373_s14 = int_to_ptr.hbm [resolvable:$true] %s372_s14 }
   0xd   :  { %v106_v14 = vld [vmem:[%s848_s1 + $0x270] sm:$0xff]  ;;  %v100_v15 = vld [vmem:[%s848_s1 + $0x240] sm:$0xff]  ;;  %v99_v17 = vld [vmem:[%s848_s1 + $0x238] sm:$0xff]  ;;  %vm363_vm1 = vcmask 80896  }
   0xe   :  { %239 = vmatpush.xpose.msra.mxu2 %v114_v9  ;;  %199 = vmatpush.xpose.msra.mxu0 %v112_v10  ;;  %v98_v16 = vld [vmem:[%s848_s1 + $0x230] sm:$0xff]  ;;  %v136_v18 = vld [vmem:[%s848_s1 + $0x360] sm:$0xff]  ;;  %v93_v19 = vld [vmem:[%s848_s1 + $0x208] sm:$0xff] }
   0xf   :  { %219 = vmatpush.xpose.msra.mxu1 %v113_v11  ;;  %v91_v20 = vld [vmem:[%s848_s1 + $0x1f8] sm:$0xff]  ;;  %256 = vmatpush.xpose.msra.mxu3 %v136_v18  ;;  %v92_v21 = vld [vmem:[%s848_s1 + $0x200] sm:$0xff]  ;;  %v129_v22 = vld [vmem:[%s848_s1 + $0x328] sm:$0xff] }
  0x10   :  { %v86_v23 = vld [vmem:[%s848_s1 + $0x1d0] sm:$0xff]  ;;  %v84_v24 = vld [vmem:[%s848_s1 + $0x1c0] sm:$0xff]  ;;  %v85_v25 = vld [vmem:[%s848_s1 + $0x1c8] sm:$0xff] }
  0x11   :  { %v79_v26 = vld [vmem:[%s848_s1 + $0x198] sm:$0xff]  ;;  %v77_v27 = vld [vmem:[%s848_s1 + $0x188] sm:$0xff]  ;;  %v122_v28 = vld [vmem:[%s848_s1 + $0x2f0] sm:$0xff] }
  0x12   :  { %240 = vmatpush.xpose.msra.mxu2 %v107_v12  ;;  %200 = vmatpush.xpose.msra.mxu0 %v105_v13  ;;  %v78_v29 = vld [vmem:[%s848_s1 + $0x190] sm:$0xff]  ;;  %v72_v30 = vld [vmem:[%s848_s1 + $0x160] sm:$0xff]  ;;  %v115_v32 = vld [vmem:[%s848_s1 + $0x2b8] sm:$0xff] }
  0x13   :  { %220 = vmatpush.xpose.msra.mxu1 %v106_v14  ;;  %257 = vmatpush.xpose.msra.mxu3 %v129_v22  ;;  %v70_v31 = vld [vmem:[%s848_s1 + $0x150] sm:$0xff]  ;;  %v71_v33 = vld [vmem:[%s848_s1 + $0x158] sm:$0xff]  ;;  %v65_v34 = vld [vmem:[%s848_s1 + $0x128] sm:$0xff] }
  0x14   :  { %v63_v35 = vld [vmem:[%s848_s1 + $0x118] sm:$0xff]  ;;  %v108_v36 = vld [vmem:[%s848_s1 + $0x280] sm:$0xff]  ;;  %v58_v38 = vld [vmem:[%s848_s1 + $0xf0] sm:$0xff] }
  0x15   :  { %v64_v37 = vld [vmem:[%s848_s1 + $0x120] sm:$0xff]  ;;  %v101_v40 = vld [vmem:[%s848_s1 + $0x248] sm:$0xff]  ;;  %v51_v42 = vld [vmem:[%s848_s1 + $0xb8] sm:$0xff] }
  0x16   :  { %241 = vmatpush.xpose.msra.mxu2 %v100_v15  ;;  %201 = vmatpush.xpose.msra.mxu0 %v98_v16  ;;  %v56_v39 = vld [vmem:[%s848_s1 + $0xe0] sm:$0xff]  ;;  %v57_v41 = vld [vmem:[%s848_s1 + $0xe8] sm:$0xff]  ;;  %v94_v44 = vld [vmem:[%s848_s1 + $0x210] sm:$0xff] }
  0x17   :  { %221 = vmatpush.xpose.msra.mxu1 %v99_v17  ;;  %258 = vmatpush.xpose.msra.mxu3 %v122_v28  ;;  %v49_v43 = vld [vmem:[%s848_s1 + $0xa8] sm:$0xff]  ;;  %v50_v45 = vld [vmem:[%s848_s1 + $0xb0] sm:$0xff]  ;;  %v44_v46 = vld [vmem:[%s848_s1 + $0x80] sm:$0xff] }
  0x18   :  { %v42_v47 = vld [vmem:[%s848_s1 + $0x70] sm:$0xff]  ;;  %v87_v48 = vld [vmem:[%s848_s1 + $0x1d8] sm:$0xff]  ;;  %v37_v50 = vld [vmem:[%s848_s1 + $0x48] sm:$0xff] }
  0x19   :  { %v43_v49 = vld [vmem:[%s848_s1 + $0x78] sm:$0xff]  ;;  %v80_v52 = vld [vmem:[%s848_s1 + $0x1a0] sm:$0xff]  ;;  %v30_v54 = vld [vmem:[%s848_s1 + $0x10] sm:$0xff] }
  0x1a   :  { %242 = vmatpush.xpose.msra.mxu2 %v93_v19  ;;  %202 = vmatpush.xpose.msra.mxu0 %v91_v20  ;;  %v35_v51 = vld [vmem:[%s848_s1 + $0x38] sm:$0xff]  ;;  %v36_v53 = vld [vmem:[%s848_s1 + $0x40] sm:$0xff]  ;;  %v73_v56 = vld [vmem:[%s848_s1 + $0x168] sm:$0xff] }
  0x1b   :  { %222 = vmatpush.xpose.msra.mxu1 %v92_v21  ;;  %259 = vmatpush.xpose.msra.mxu3 %v115_v32  ;;  %v28_v55 = vld [vmem:[%s848_s1] sm:$0xff]  ;;  %v139_v57 = vld [vmem:[%s848_s1 + $0x378] sm:$0xff]  ;;  %v137_v58 = vld [vmem:[%s848_s1 + $0x368] sm:$0xff] }
  0x1c   :  { %v29_v59 = vld [vmem:[%s848_s1 + $0x8] sm:$0xff]  ;;  %v138_v60 = vld [vmem:[%s848_s1 + $0x370] sm:$0xff]  ;;  %v132_v62 = vld [vmem:[%s848_s1 + $0x340] sm:$0xff] }
  0x1d   :  { %v66_v61 = vld [vmem:[%s848_s1 + $0x130] sm:$0xff]  ;;  %v131_v0 = vld [vmem:[%s848_s1 + $0x338] sm:$0xff]  ;;  %v125_v2 = vld [vmem:[%s848_s1 + $0x308] sm:$0xff] }
  0x1e   :  { %243 = vmatpush.xpose.msra.mxu2 %v86_v23  ;;  %203 = vmatpush.xpose.msra.mxu0 %v84_v24  ;;  %v130_v63 = vld [vmem:[%s848_s1 + $0x330] sm:$0xff]  ;;  %v59_v1 = vld [vmem:[%s848_s1 + $0xf8] sm:$0xff]  ;;  %v124_v4 = vld [vmem:[%s848_s1 + $0x300] sm:$0xff] }
  0x1f   :  { %223 = vmatpush.xpose.msra.mxu1 %v85_v25  ;;  %260 = vmatpush.xpose.msra.mxu3 %v108_v36  ;;  %v123_v3 = vld [vmem:[%s848_s1 + $0x2f8] sm:$0xff]  ;;  %v52_v5 = vld [vmem:[%s848_s1 + $0xc0] sm:$0xff]  ;;  %v118_v6 = vld [vmem:[%s848_s1 + $0x2d0] sm:$0xff] }
  0x20   :  { %v116_v7 = vld [vmem:[%s848_s1 + $0x2c0] sm:$0xff]  ;;  %v117_v8 = vld [vmem:[%s848_s1 + $0x2c8] sm:$0xff]  ;;  %v111_v10 = vld [vmem:[%s848_s1 + $0x298] sm:$0xff] }
  0x21   :  { %v45_v9 = vld [vmem:[%s848_s1 + $0x88] sm:$0xff]  ;;  %v110_v12 = vld [vmem:[%s848_s1 + $0x290] sm:$0xff]  ;;  %v104_v14 = vld [vmem:[%s848_s1 + $0x260] sm:$0xff] }
  0x22   :  { %244 = vmatpush.xpose.msra.mxu2 %v79_v26  ;;  %204 = vmatpush.xpose.msra.mxu0 %v77_v27  ;;  %v109_v11 = vld [vmem:[%s848_s1 + $0x288] sm:$0xff]  ;;  %v38_v13 = vld [vmem:[%s848_s1 + $0x50] sm:$0xff]  ;;  %v103_v16 = vld [vmem:[%s848_s1 + $0x258] sm:$0xff] }
  0x23   :  { %224 = vmatpush.xpose.msra.mxu1 %v78_v29  ;;  %261 = vmatpush.xpose.msra.mxu3 %v101_v40  ;;  %v102_v15 = vld [vmem:[%s848_s1 + $0x250] sm:$0xff]  ;;  %v31_v17 = vld [vmem:[%s848_s1 + $0x18] sm:$0xff]  ;;  %v97_v19 = vld [vmem:[%s848_s1 + $0x228] sm:$0xff] }
  0x24   :  { %v23_v18 = vld [vmem:[%s847_s0 + $0x10] sm:$0xff]  ;;  %v95_v20 = vld [vmem:[%s848_s1 + $0x218] sm:$0xff]  ;;  %v96_v21 = vld [vmem:[%s848_s1 + $0x220] sm:$0xff] }
  0x25   :  { %v21_v22 = vld [vmem:[%s847_s0] sm:$0xff]  ;;  %v24_v23 = vld [vmem:[%s847_s0 + $0x18] sm:$0xff]  ;;  %v90_v24 = vld [vmem:[%s848_s1 + $0x1f0] sm:$0xff] }
  0x26   :  { %245 = vmatpush.xpose.msra.mxu2 %v72_v30  ;;  %205 = vmatpush.xpose.msra.mxu0 %v70_v31  ;;  %v88_v25 = vld [vmem:[%s848_s1 + $0x1e0] sm:$0xff]  ;;  %v22_v26 = vld [vmem:[%s847_s0 + $0x8] sm:$0xff]  ;;  %v83_v28 = vld [vmem:[%s848_s1 + $0x1b8] sm:$0xff] }
  0x27   :  { %225 = vmatpush.xpose.msra.mxu1 %v71_v33  ;;  %262 = vmatpush.xpose.msra.mxu3 %v94_v44  ;;  %v89_v27 = vld [vmem:[%s848_s1 + $0x1e8] sm:$0xff]  ;;  %v82_v30 = vld [vmem:[%s848_s1 + $0x1b0] sm:$0xff]  ;;  %v76_v31 = vld [vmem:[%s848_s1 + $0x180] sm:$0xff] }
  0x28   :  { %v81_v29 = vld [vmem:[%s848_s1 + $0x1a8] sm:$0xff]  ;;  %v74_v32 = vld [vmem:[%s848_s1 + $0x170] sm:$0xff]  ;;  %v75_v33 = vld [vmem:[%s848_s1 + $0x178] sm:$0xff] }
  0x29   :  { %v68_v36 = vld [vmem:[%s848_s1 + $0x140] sm:$0xff]  ;;  %v55_v40 = vld [vmem:[%s848_s1 + $0xd8] sm:$0xff]  ;;  %v46_v44 = vld [vmem:[%s848_s1 + $0x90] sm:$0xff] }
  0x2a   :  { %246 = vmatpush.xpose.msra.mxu2 %v65_v34  ;;  %206 = vmatpush.xpose.msra.mxu0 %v63_v35  ;;  %v69_v34 = vld [vmem:[%s848_s1 + $0x148] sm:$0xff]  ;;  %v67_v35 = vld [vmem:[%s848_s1 + $0x138] sm:$0xff] }
  0x2b   :  { %226 = vmatpush.xpose.msra.mxu1 %v64_v37  ;;  %263 = vmatpush.xpose.msra.mxu3 %v87_v48  ;;  %v62_v37 = vld [vmem:[%s848_s1 + $0x110] sm:$0xff]  ;;  %v40_v48 = vld [vmem:[%s848_s1 + $0x60] sm:$0xff] }
  0x2e   :  { %247 = vmatpush.xpose.msra.mxu2 %v58_v38  ;;  %207 = vmatpush.xpose.msra.mxu0 %v56_v39  ;;  %v60_v38 = vld [vmem:[%s848_s1 + $0x100] sm:$0xff]  ;;  %v61_v39 = vld [vmem:[%s848_s1 + $0x108] sm:$0xff] }
  0x2f   :  { %227 = vmatpush.xpose.msra.mxu1 %v57_v41  ;;  %264 = vmatpush.xpose.msra.mxu3 %v80_v52  ;;  %v53_v41 = vld [vmem:[%s848_s1 + $0xc8] sm:$0xff]  ;;  %v27_v52 = vld [vmem:[%s847_s0 + $0x30] sm:$0xff] }
  0x32   :  { %248 = vmatpush.xpose.msra.mxu2 %v51_v42  ;;  %208 = vmatpush.xpose.msra.mxu0 %v49_v43  ;;  %v54_v42 = vld [vmem:[%s848_s1 + $0xd0] sm:$0xff]  ;;  %v48_v43 = vld [vmem:[%s848_s1 + $0xa0] sm:$0xff] }
  0x33   :  { %228 = vmatpush.xpose.msra.mxu1 %v50_v45  ;;  %265 = vmatpush.xpose.msra.mxu3 %v73_v56  ;;  %v47_v45 = vld [vmem:[%s848_s1 + $0x98] sm:$0xff]  ;;  %v337_v56 = vld [vmem:[%s850_s3] sm:$0xff] }
  0x36   :  { %249 = vmatpush.xpose.msra.mxu2 %v44_v46  ;;  %209 = vmatpush.xpose.msra.mxu0 %v42_v47  ;;  %v41_v46 = vld [vmem:[%s848_s1 + $0x68] sm:$0xff]  ;;  %v39_v47 = vld [vmem:[%s848_s1 + $0x58] sm:$0xff] }
  0x37   :  { %229 = vmatpush.xpose.msra.mxu1 %v43_v49  ;;  %266 = vmatpush.xpose.msra.mxu3 %v66_v61  ;;  %v34_v49 = vld [vmem:[%s848_s1 + $0x30] sm:$0xff] }
  0x3a   :  { %250 = vmatpush.xpose.msra.mxu2 %v37_v50  ;;  %210 = vmatpush.xpose.msra.mxu0 %v35_v51  ;;  %v32_v50 = vld [vmem:[%s848_s1 + $0x20] sm:$0xff]  ;;  %v33_v51 = vld [vmem:[%s848_s1 + $0x28] sm:$0xff] }
  0x3b   :  { %230 = vmatpush.xpose.msra.mxu1 %v36_v53  ;;  %267 = vmatpush.xpose.msra.mxu3 %v59_v1  ;;  %v25_v53 = vld [vmem:[%s847_s0 + $0x20] sm:$0xff] }
  0x3e   :  { %251 = vmatpush.xpose.msra.mxu2 %v30_v54  ;;  %211 = vmatpush.xpose.msra.mxu0 %v28_v55  ;;  %v26_v54 = vld [vmem:[%s847_s0 + $0x28] sm:$0xff] }
  0x3f   :  { %231 = vmatpush.xpose.msra.mxu1 %v29_v59  ;;  %268 = vmatpush.xpose.msra.mxu3 %v52_v5  ;;  %v338_v55 = vld [vmem:[%s850_s3 + $0x8] sm:$0x3] }
  0x41   :  { %252 = vmatmul.f32.vlgmr.msra.gmra.mxu2 %v23_v18  ;;  %212 = vmatmul.f32.vlgmr.msra.gmra.mxu0 %v21_v22 }
  0x42   :  { %381 = vmatpush.xpose.msk.msrb.mxu2 %vm144_vm0, %v139_v57  ;;  %276 = vmatpush.xpose.msrb.mxu0 %v137_v58  ;;  %v399_v57 = vld [vmem:[%s849_s2] ss:$0 sm:$0xff]  ;;  %s427_s2 = smov [#allocation2]  }
  0x43   :  { %296 = vmatpush.xpose.msrb.mxu1 %v138_v60  ;;  %269 = vmatpush.xpose.msra.mxu3 %v45_v9  ;;  %v400_v9 = vld [vmem:[%s851_s4] ss:$0 sm:$0xff]  ;;  %s370_s11 = sshll.u32 %s427_s2, 4  ;;  %s371_s11 = int_to_ptr.vmem [resolvable:$true] %s370_s11 }
  0x44   :  { %232 = vmatmul.f32.vlgmr.msra.gmra.mxu1 %v22_v26 }
  0x46   :  { %382 = vmatpush.xpose.msk.msrb.mxu2 %vm144_vm0, %v132_v62  ;;  %277 = vmatpush.xpose.msrb.mxu0 %v130_v63 }
  0x47   :  { %297 = vmatpush.xpose.msrb.mxu1 %v131_v0  ;;  %270 = vmatpush.xpose.msra.mxu3 %v38_v13 }
  0x4a   :  { %383 = vmatpush.xpose.msk.msrb.mxu2 %vm144_vm0, %v125_v2  ;;  %278 = vmatpush.xpose.msrb.mxu0 %v123_v3 }
  0x4b   :  { %298 = vmatpush.xpose.msrb.mxu1 %v124_v4  ;;  %271 = vmatpush.xpose.msra.mxu3 %v31_v17 }
  0x4e   :  { %384 = vmatpush.xpose.msk.msrb.mxu2 %vm144_vm0, %v118_v6  ;;  %279 = vmatpush.xpose.msrb.mxu0 %v116_v7 }
  0x4f   :  { %299 = vmatpush.xpose.msrb.mxu1 %v117_v8  ;;  %272 = vmatmul.f32.vlgmr.msra.gmra.mxu3 %v24_v23 }
  0x50   :  { %357 = vmatpush.xpose.msrb.mxu3 %v338_v55 }
  0x52   :  { %385 = vmatpush.xpose.msk.msrb.mxu2 %vm144_vm0, %v111_v10  ;;  %280 = vmatpush.xpose.msrb.mxu0 %v109_v11 }
  0x53   :  { %300 = vmatpush.xpose.msrb.mxu1 %v110_v12 }
  0x54   :  { %358 = vmatpush.xpose.msrb.mxu3 %v337_v56 }
  0x56   :  { %386 = vmatpush.xpose.msk.msrb.mxu2 %vm144_vm0, %v104_v14  ;;  %281 = vmatpush.xpose.msrb.mxu0 %v102_v15 }
  0x57   :  { %301 = vmatpush.xpose.msrb.mxu1 %v103_v16 }
  0x5a   :  { %387 = vmatpush.xpose.msk.msrb.mxu2 %vm144_vm0, %v97_v19  ;;  %282 = vmatpush.xpose.msrb.mxu0 %v95_v20 }
  0x5b   :  { %302 = vmatpush.xpose.msrb.mxu1 %v96_v21 }
  0x5e   :  { %388 = vmatpush.xpose.msk.msrb.mxu2 %vm144_vm0, %v90_v24  ;;  %283 = vmatpush.xpose.msrb.mxu0 %v88_v25 }
  0x5f   :  { %303 = vmatpush.xpose.msrb.mxu1 %v89_v27 }
  0x62   :  { %389 = vmatpush.xpose.msk.msrb.mxu2 %vm144_vm0, %v83_v28  ;;  %284 = vmatpush.xpose.msrb.mxu0 %v81_v29 }
  0x63   :  { %304 = vmatpush.xpose.msrb.mxu1 %v82_v30 }
  0x66   :  { %390 = vmatpush.xpose.msk.msrb.mxu2 %vm144_vm0, %v76_v31  ;;  %285 = vmatpush.xpose.msrb.mxu0 %v74_v32 }
  0x67   :  { %305 = vmatpush.xpose.msrb.mxu1 %v75_v33 }
  0x6a   :  { %391 = vmatpush.xpose.msk.msrb.mxu2 %vm144_vm0, %v69_v34  ;;  %286 = vmatpush.xpose.msrb.mxu0 %v67_v35 }
  0x6b   :  { %306 = vmatpush.xpose.msrb.mxu1 %v68_v36 }
  0x6e   :  { %392 = vmatpush.xpose.msk.msrb.mxu2 %vm144_vm0, %v62_v37  ;;  %287 = vmatpush.xpose.msrb.mxu0 %v60_v38 }
  0x6f   :  { %307 = vmatpush.xpose.msrb.mxu1 %v61_v39 }
  0x72   :  { %393 = vmatpush.xpose.msk.msrb.mxu2 %vm144_vm0, %v55_v40  ;;  %288 = vmatpush.xpose.msrb.mxu0 %v53_v41 }
  0x73   :  { %308 = vmatpush.xpose.msrb.mxu1 %v54_v42 }
  0x76   :  { %394 = vmatpush.xpose.msk.msrb.mxu2 %vm144_vm0, %v48_v43  ;;  %289 = vmatpush.xpose.msrb.mxu0 %v46_v44 }
  0x77   :  { %309 = vmatpush.xpose.msrb.mxu1 %v47_v45 }
  0x7a   :  { %395 = vmatpush.xpose.msk.msrb.mxu2 %vm144_vm0, %v41_v46  ;;  %290 = vmatpush.xpose.msrb.mxu0 %v39_v47 }
  0x7b   :  { %310 = vmatpush.xpose.msrb.mxu1 %v40_v48 }
  0x7e   :  { %396 = vmatpush.xpose.msk.msrb.mxu2 %vm144_vm0, %v34_v49  ;;  %291 = vmatpush.xpose.msrb.mxu0 %v32_v50 }
  0x7f   :  { %311 = vmatpush.xpose.msrb.mxu1 %v33_v51 }
  0x81   :  { %397 = vmatmul.msk.f32.vlgmr.msrb.gmra.mxu2 %vm144_vm0, %v27_v52  ;;  %292 = vmatmul.f32.vlgmr.msrb.gmra.mxu0 %v25_v53 }
  0x82   :  { %312 = vmatmul.f32.vlgmr.msrb.gmra.mxu1 %v26_v54 }
  0xbe   :  { %v213_v58 = vpop.f32.mrf.mxu0 }
  0xbf   :  { %v214_v59 = vadd.f32 %v399_v57, %v213_v58 }
  0xc1   :  { %v233_v60 = vpop.f32.mrf.mxu1 }
  0xc2   :  { %v234_v61 = vadd.f32 %v233_v60, %v214_v59 }
  0xc4   :  { %v253_v62 = vpop.f32.mrf.mxu2 }
  0xc5   :  { %v254_v63 = vadd.f32 %v253_v62, %v234_v61 }
  0xd2   :  { %v273_v0 = vpop.f32.mrf.mxu3 }
  0xd3   :  { %v274_v1 = vadd.f32 %v273_v0, %v254_v63 }
  0xfe   :  { %v293_v2 = vpop.f32.mrf.mxu0 }
  0xff   :  { %v294_v3 = vadd.f32 %v293_v2, %v274_v1  ;;  %v313_v4 = vpop.f32.mrf.mxu1 }
 0x101   :  { %v314_v5 = vadd.f32 %v313_v4, %v294_v3 }
 0x104   :  { %v333_v6 = vpop.f32.mrf.mxu2 }
 0x105   :  { %v334_v7 = vadd.f32 %v333_v6, %v314_v5 }
 0x107   :  { %v336_v8 = vmax.f32 %v334_v7, 0.0 }
 0x109   :  { %359 = vmatmul.f32.vlgmr.msrb.gmra.mxu3 %v336_v8 }
 0x18c   :  { %v360_v10 = vpop.f32.mrf.mxu3 }
 0x18d   :  { %v361_v11 = vadd.f32 %v400_v9, %v360_v10 }
 0x18f   :  { %364 = vst.msk [vmem:[#allocation2] sm:$0xff] %vm363_vm1, %v361_v11 }
 0x190   :  { %375 = dma.vmem_to_hbm [thread:$0]  %s371_s11, 128, %s373_s14, [#allocation3]  }
 0x191   :  { %425 = dma.done.wait [#allocation3], 128  }
 0x192   :  { %426 = vsyncadd [#allocation3], 4294967168 }
 0x193   :  { %380 = vsyncpa [#allocation3], 1 }

</bundles_post_ra>
